<compile_context>
chip_gen: v5e
topology: v5e:2x2
jax: 0.10.0
libtpu: 0.0.40
codegen_flags: <defaults>
</compile_context>

<pallas_src>
import jax
import jax.numpy as jnp
from jax import lax
from jax.experimental import pallas as pl
from jax.experimental.pallas import tpu as pltpu


def summation_kernel(words_ref, emb_ref, out_ref):
    # words_ref: (TR, W) int32   -- token ids for TR flattened (batch, seq) rows
    # emb_ref:   (V, D)  bf16    -- embedding table, row 0 zeroed (padding)
    # out_ref:   (TR, D) float32
    words = words_ref[...]                       # (TR, W) int32
    tr, w_len = words.shape
    v = emb_ref.shape[0]

    # counts[r, v] = #{w : words[r, w] == v}; accumulated in int32 over the
    # small static word axis, against a (1, V) iota (broadcast), never
    # materializing a (TR, W, V) one-hot.
    vocab_iota = lax.broadcasted_iota(jnp.int32, (1, v), 1)          # (1, V)
    counts = jnp.zeros((tr, v), jnp.int32)
    for w in range(w_len):                                           # unrolled
        counts = counts + (words[:, w:w + 1] == vocab_iota).astype(jnp.int32)

    # Padding (token 0) needs no mask: row 0 of emb_ref is zero, so its
    # column of counts multiplies a zero row.
    # example_rep[r, :] = sum_w E[words[r, w]] == counts @ E  (MXU, bf16 in,
    # f32 accumulate; counts <= W are exact in bf16).
    out_ref[...] = jnp.dot(counts.astype(emb_ref.dtype), emb_ref[...],
                           preferred_element_type=jnp.float32)


def summation_forward(words, emb_table, *, row_tile=None):
    """words: int [B, S, W]; emb_table: float [V, D] -> float32 [B, S, D]."""
    B, S, W = words.shape
    V, D = emb_table.shape
    R = B * S

    def round_up(x, m):
        return (x + m - 1) // m * m

    # Padding token 0 is handled once here by zeroing row 0 of the table, so
    # the kernel needs no lane mask. Downcast f32 tables to bf16 for native
    # MXU rate and half the HBM/VMEM traffic; bf16 tables pass through as-is
    # (never upcast).
    emb = emb_table.at[0].set(0)
    if emb.dtype != jnp.bfloat16:
        emb = emb.astype(jnp.bfloat16)

    # Row tile: 256 fills the 256-wide v6e/v7x MXU; 128 already fills v5e's
    # 128x128 MXU.
    if row_tile is None:
        kind = jax.devices()[0].device_kind.lower()
        row_tile = 128 if ("v5" in kind or "v4" in kind or "v3" in kind) else 256

    words2d = words.reshape(R, W).astype(jnp.int32)
    tr = min(row_tile, round_up(R, 8))

    # Keep the tile within a conservative per-core VMEM budget (v7x has only
    # 64 MiB physical / ~32 MiB default scoped per TensorCore).
    def vmem_estimate(tr_):
        return (V * D * emb.dtype.itemsize * 2      # table (worst case 2 bufs)
                + tr_ * W * 4 * 2                   # double-buffered token tiles
                + tr_ * D * 4 * 2                   # double-buffered output tiles
                + tr_ * V * 8)                      # counts temporaries (i32+bf16)

    VMEM_BUDGET = 48 * 1024 * 1024
    while tr > 8 and vmem_estimate(tr) > VMEM_BUDGET:
        tr = max(8, (tr // 16) * 8)                 # halve, stay multiple of 8

    r_pad = round_up(R, tr)
    if r_pad != R:
        # Pad with token 0 -> hits the zeroed table row, contributes zero.
        words2d = jnp.pad(words2d, ((0, r_pad - R), (0, 0)))
    grid = (r_pad // tr,)

    vmem_limit_bytes = int(min(max(2 * vmem_estimate(tr), 32 * 1024 * 1024),
                               96 * 1024 * 1024))

    def build(single_buffer_table):
        if single_buffer_table:
            # The table's block index is constant across the grid; request a
            # single buffer so it is not double-buffered (halves its VMEM cost,
            # matters for production tables on v7x's 64 MiB VMEM).
            table_spec = pl.BlockSpec((V, D), lambda r: (0, 0),
                                      pipeline_mode=pl.Buffered(buffer_count=1))
        else:
            table_spec = pl.BlockSpec((V, D), lambda r: (0, 0))
        return pl.pallas_call(
            summation_kernel,
            out_shape=jax.ShapeDtypeStruct((r_pad, D), jnp.float32),
            grid_spec=pltpu.PrefetchScalarGridSpec(
                num_scalar_prefetch=0,
                grid=grid,
                in_specs=[
                    pl.BlockSpec((tr, W), lambda r: (r, 0)),   # row tile of tokens
                    table_spec,                                # full embedding table
                ],
                out_specs=pl.BlockSpec((tr, D), lambda r: (r, 0)),
            ),
            compiler_params=pltpu.CompilerParams(
                dimension_semantics=("parallel",),
                vmem_limit_bytes=vmem_limit_bytes),
        )

    try:
        out = jax.block_until_ready(build(True)(words2d, emb))
    except Exception:
        # pipeline_mode=pl.Buffered(1) unsupported on this jax build; fall back
        # to the default (still index-constant, so no re-DMA) table spec.
        out = build(False)(words2d, emb)

    return out[:R].reshape(B, S, D)


def summation_reference(words, emb_table):
    # Pure-JAX reference mirroring the PyTorch forward exactly (f32 gather+sum).
    nonzero = (words != 0).astype(jnp.float32)                 # (B, S, W)
    embs = emb_table[words].astype(jnp.float32) * nonzero[..., None]
    return jnp.sum(embs, axis=2)                               # (B, S, D)


if __name__ == "__main__":
    # Small shapes consistent with the module's forward:
    #   batch=2, seq_len=8, word_len=4, vocab_size=128, embedding_dim=128
    B, S, W, V, D = 2, 8, 4, 128, 128

    key = jax.random.PRNGKey(0)
    k_words, k_emb = jax.random.split(key)

    words = jax.random.randint(k_words, (B, S, W), 0, V, dtype=jnp.int32)
    # Force some padding (token id 0) so the nonzero mask is exercised.
    words = words.at[:, :, -1].set(0)
    words = words.at[0, 0, :].set(0)

    # Deterministic "embeddings_init" (nn.Embedding default ~ N(0, 1)).
    emb_table = jax.random.normal(k_emb, (V, D), dtype=jnp.float32)

    out = summation_forward(words, emb_table)
    out = jax.block_until_ready(out)

    assert out.shape == (B, S, D), out.shape
    assert out.dtype == jnp.float32, out.dtype

    # Exact f32 reference (PyTorch semantics): tolerance relaxed to cover the
    # deliberate bf16 cast of the embedding table (counts stay exact).
    expected_f32 = summation_reference(words, emb_table)
    assert jnp.allclose(out, expected_f32, atol=5e-2, rtol=5e-2), (
        "Pallas output does not match f32 reference within bf16 tolerance")

    # Tight check against a reference using the same bf16 table: the only
    # remaining difference is f32 accumulation order.
    emb_bf16_as_f32 = emb_table.at[0].set(0).astype(jnp.bfloat16).astype(jnp.float32)
    expected_bf16 = summation_reference(words, emb_bf16_as_f32)
    assert jnp.allclose(out, expected_bf16, atol=1e-4, rtol=1e-4), (
        "Pallas output does not match bf16-table reference")

    print("KERNEL_OK")
</pallas_src>

<mosaic_0001>
module attributes {stable_mosaic.version = 11 : i64} {
  func.func @summation_kernel(%arg0: i32, %arg1: memref<16x4xi32, #tpu.memory_space<vmem>>, %arg2: memref<128x128xbf16, #tpu.memory_space<vmem>>, %arg3: memref<16x128xf32, #tpu.memory_space<vmem>>) attributes {dimension_semantics = [#tpu.dimension_semantics<parallel>], iteration_bounds = array<i64: 1>, scalar_prefetch = 0 : i64, scratch_operands = 0 : i64, tpu.core_type = #tpu.core_type<tc>, window_params = [{transform_indices = @transform_0, window_bounds = array<i64: 16, 4>}, {pipeline_mode = #tpu.pipeline_mode<synchronous>, transform_indices = @transform_1, window_bounds = array<i64: 128, 128>}, {transform_indices = @transform_2, window_bounds = array<i64: 16, 128>}]} {
    %c0 = arith.constant 0 : index
    %c0_0 = arith.constant 0 : index
    %0 = vector.load %arg1[%c0, %c0_0] : memref<16x4xi32, #tpu.memory_space<vmem>>, vector<16x4xi32>
    %1 = tpu.iota {dimensions = array<i32: 1>} : vector<1x128xi32>
    %c0_i32 = arith.constant 0 : i32
    %2 = vector.broadcast %c0_i32 : i32 to vector<16x128xi32>
    %3 = vector.extract_strided_slice %0 {offsets = [0, 0], sizes = [16, 1], strides = [1, 1]} : vector<16x4xi32> to vector<16x1xi32>
    %4 = vector.broadcast %3 : vector<16x1xi32> to vector<16x128xi32>
    %5 = vector.broadcast %1 : vector<1x128xi32> to vector<16x128xi32>
    %6 = arith.cmpi eq, %4, %5 : vector<16x128xi32>
    %7 = arith.extui %6 : vector<16x128xi1> to vector<16x128xi32>
    %8 = arith.addi %2, %7 : vector<16x128xi32>
    %9 = vector.extract_strided_slice %0 {offsets = [0, 1], sizes = [16, 1], strides = [1, 1]} : vector<16x4xi32> to vector<16x1xi32>
    %10 = vector.broadcast %9 : vector<16x1xi32> to vector<16x128xi32>
    %11 = vector.broadcast %1 : vector<1x128xi32> to vector<16x128xi32>
    %12 = arith.cmpi eq, %10, %11 : vector<16x128xi32>
    %13 = arith.extui %12 : vector<16x128xi1> to vector<16x128xi32>
    %14 = arith.addi %8, %13 : vector<16x128xi32>
    %15 = vector.extract_strided_slice %0 {offsets = [0, 2], sizes = [16, 1], strides = [1, 1]} : vector<16x4xi32> to vector<16x1xi32>
    %16 = vector.broadcast %15 : vector<16x1xi32> to vector<16x128xi32>
    %17 = vector.broadcast %1 : vector<1x128xi32> to vector<16x128xi32>
    %18 = arith.cmpi eq, %16, %17 : vector<16x128xi32>
    %19 = arith.extui %18 : vector<16x128xi1> to vector<16x128xi32>
    %20 = arith.addi %14, %19 : vector<16x128xi32>
    %21 = vector.extract_strided_slice %0 {offsets = [0, 3], sizes = [16, 1], strides = [1, 1]} : vector<16x4xi32> to vector<16x1xi32>
    %22 = vector.broadcast %21 : vector<16x1xi32> to vector<16x128xi32>
    %23 = vector.broadcast %1 : vector<1x128xi32> to vector<16x128xi32>
    %24 = arith.cmpi eq, %22, %23 : vector<16x128xi32>
    %25 = arith.extui %24 : vector<16x128xi1> to vector<16x128xi32>
    %26 = arith.addi %20, %25 : vector<16x128xi32>
    %27 = arith.sitofp %26 : vector<16x128xi32> to vector<16x128xbf16>
    %c0_1 = arith.constant 0 : index
    %c0_2 = arith.constant 0 : index
    %28 = vector.load %arg2[%c0_1, %c0_2] : memref<128x128xbf16, #tpu.memory_space<vmem>>, vector<128x128xbf16>
    %cst = arith.constant dense<0.000000e+00> : vector<16x128xf32>
    %29 = tpu.matmul %27, %28, %cst {dimension_numbers = #tpu.dot_dimension_numbers<[1], [0], [0], [1], [0, 0, 1, 1], [], []>} : vector<16x128xbf16>, vector<128x128xbf16>, vector<16x128xf32> -> vector<16x128xf32>
    %c0_3 = arith.constant 0 : index
    %c0_4 = arith.constant 0 : index
    %30 = vector.load %arg3[%c0_3, %c0_4] : memref<16x128xf32, #tpu.memory_space<vmem>>, vector<16x128xf32>
    tpu.vector_store %arg3[%c0_3, %c0_4], %29 {strides = array<i32>} : memref<16x128xf32, #tpu.memory_space<vmem>>, vector<16x128xf32>,
    return
  }
  func.func @transform_0(%arg0: i32) -> (i32, i32) {
    %c0_i32 = arith.constant 0 : i32
    %c0_i32_0 = arith.constant 0 : i32
    return %arg0, %c0_i32 : i32, i32
  }
  func.func @transform_1(%arg0: i32) -> (i32, i32) {
    %c0_i32 = arith.constant 0 : i32
    %c0_i32_0 = arith.constant 0 : i32
    %c0_i32_1 = arith.constant 0 : i32
    return %c0_i32, %c0_i32_0 : i32, i32
  }
  func.func @transform_2(%arg0: i32) -> (i32, i32) {
    %c0_i32 = arith.constant 0 : i32
    %c0_i32_0 = arith.constant 0 : i32
    return %arg0, %c0_i32 : i32, i32
  }
}

module attributes {stable_mosaic.version = 11 : i64} {
  func.func @summation_kernel(%arg0: i32, %arg1: memref<16x4xi32, #tpu.memory_space<vmem>>, %arg2: memref<128x128xbf16, #tpu.memory_space<vmem>>, %arg3: memref<16x128xf32, #tpu.memory_space<vmem>>) attributes {dimension_semantics = [#tpu.dimension_semantics<parallel>], iteration_bounds = array<i64: 1>, scalar_prefetch = 0 : i64, scratch_operands = 0 : i64, tpu.core_type = #tpu.core_type<tc>, window_params = [{transform_indices = @transform_0, window_bounds = array<i64: 16, 4>}, {pipeline_mode = #tpu.pipeline_mode<synchronous>, transform_indices = @transform_1, window_bounds = array<i64: 128, 128>}, {transform_indices = @transform_2, window_bounds = array<i64: 16, 128>}]} {
    %c0 = arith.constant 0 : index
    %c0_0 = arith.constant 0 : index
    %0 = vector.load %arg1[%c0, %c0_0] : memref<16x4xi32, #tpu.memory_space<vmem>>, vector<16x4xi32>
    %1 = tpu.iota {dimensions = array<i32: 1>} : vector<1x128xi32>
    %c0_i32 = arith.constant 0 : i32
    %2 = vector.broadcast %c0_i32 : i32 to vector<16x128xi32>
    %3 = vector.extract_strided_slice %0 {offsets = [0, 0], sizes = [16, 1], strides = [1, 1]} : vector<16x4xi32> to vector<16x1xi32>
    %4 = vector.broadcast %3 : vector<16x1xi32> to vector<16x128xi32>
    %5 = vector.broadcast %1 : vector<1x128xi32> to vector<16x128xi32>
    %6 = arith.cmpi eq, %4, %5 : vector<16x128xi32>
    %7 = arith.extui %6 : vector<16x128xi1> to vector<16x128xi32>
    %8 = arith.addi %2, %7 : vector<16x128xi32>
    %9 = vector.extract_strided_slice %0 {offsets = [0, 1], sizes = [16, 1], strides = [1, 1]} : vector<16x4xi32> to vector<16x1xi32>
    %10 = vector.broadcast %9 : vector<16x1xi32> to vector<16x128xi32>
    %11 = vector.broadcast %1 : vector<1x128xi32> to vector<16x128xi32>
    %12 = arith.cmpi eq, %10, %11 : vector<16x128xi32>
    %13 = arith.extui %12 : vector<16x128xi1> to vector<16x128xi32>
    %14 = arith.addi %8, %13 : vector<16x128xi32>
    %15 = vector.extract_strided_slice %0 {offsets = [0, 2], sizes = [16, 1], strides = [1, 1]} : vector<16x4xi32> to vector<16x1xi32>
    %16 = vector.broadcast %15 : vector<16x1xi32> to vector<16x128xi32>
    %17 = vector.broadcast %1 : vector<1x128xi32> to vector<16x128xi32>
    %18 = arith.cmpi eq, %16, %17 : vector<16x128xi32>
    %19 = arith.extui %18 : vector<16x128xi1> to vector<16x128xi32>
    %20 = arith.addi %14, %19 : vector<16x128xi32>
    %21 = vector.extract_strided_slice %0 {offsets = [0, 3], sizes = [16, 1], strides = [1, 1]} : vector<16x4xi32> to vector<16x1xi32>
    %22 = vector.broadcast %21 : vector<16x1xi32> to vector<16x128xi32>
    %23 = vector.broadcast %1 : vector<1x128xi32> to vector<16x128xi32>
    %24 = arith.cmpi eq, %22, %23 : vector<16x128xi32>
    %25 = arith.extui %24 : vector<16x128xi1> to vector<16x128xi32>
    %26 = arith.addi %20, %25 : vector<16x128xi32>
    %27 = arith.sitofp %26 : vector<16x128xi32> to vector<16x128xbf16>
    %c0_1 = arith.constant 0 : index
    %c0_2 = arith.constant 0 : index
    %28 = vector.load %arg2[%c0_1, %c0_2] : memref<128x128xbf16, #tpu.memory_space<vmem>>, vector<128x128xbf16>
    %cst = arith.constant dense<0.000000e+00> : vector<16x128xf32>
    %29 = tpu.matmul %27, %28, %cst {dimension_numbers = #tpu.dot_dimension_numbers<[1], [0], [0], [1], [0, 0, 1, 1], [], []>} : vector<16x128xbf16>, vector<128x128xbf16>, vector<16x128xf32> -> vector<16x128xf32>
    %c0_3 = arith.constant 0 : index
    %c0_4 = arith.constant 0 : index
    %30 = vector.load %arg3[%c0_3, %c0_4] : memref<16x128xf32, #tpu.memory_space<vmem>>, vector<16x128xf32>
    tpu.vector_store %arg3[%c0_3, %c0_4], %29 {strides = array<i32>} : memref<16x128xf32, #tpu.memory_space<vmem>>, vector<16x128xf32>,
    return
  }
  func.func @transform_0(%arg0: i32) -> (i32, i32) {
    %c0_i32 = arith.constant 0 : i32
    %c0_i32_0 = arith.constant 0 : i32
    return %arg0, %c0_i32 : i32, i32
  }
  func.func @transform_1(%arg0: i32) -> (i32, i32) {
    %c0_i32 = arith.constant 0 : i32
    %c0_i32_0 = arith.constant 0 : i32
    %c0_i32_1 = arith.constant 0 : i32
    return %c0_i32, %c0_i32_0 : i32, i32
  }
  func.func @transform_2(%arg0: i32) -> (i32, i32) {
    %c0_i32 = arith.constant 0 : i32
    %c0_i32_0 = arith.constant 0 : i32
    return %arg0, %c0_i32 : i32, i32
  }
}

</mosaic_0001>

<bundles_post_ra>
// kernel: tpu_custom_call.1
= control target key start
LH: loop header
LB: loop body
LE: loop exit
PB: predicated region body
PF: predicated region fallthrough
CT: control target
= control target key end

     0   :  { %7 = vsyncpa [#allocation3], 0  ;;  %s324_s0 = inlined_call_operand.vmem [shape: s32[16,4], index: 0, kind: input, shape index: {}]   ;;  %s325_s1 = inlined_call_operand.hbm [shape: bf16[128,128], index: 1, kind: input, shape index: {}]   ;;  %s326_s2 = inlined_call_operand.hbm [shape: f32[16,128], index: 2, kind: output, shape index: {}]  }
   0x1   :  { %8 = vsyncpa [#allocation4], 0  ;;  %s15_s11 = sshll.u32 %s325_s1, 4  ;;  %s287_s12 = smov [#allocation2]   ;;  %s16_s11 = int_to_ptr.hbm [resolvable:$true] %s15_s11 }
   0x2   :  { %s17_s13 = sshll.u32 %s287_s12, 4  ;;  %s288_s14 = smov 64   ;;  %s18_s13 = int_to_ptr.vmem [resolvable:$true] %s17_s13 }
   0x3   :  { %s289_s15 = smov 4  }
   0x4   :  { %23 = dma.hbm_to_vmem [thread:$0]  %s16_s11, 1024, %s18_s13, [#allocation3], %s288_s14, %s288_s14, %s289_s15  }
   0x5   :  { %283 = dma.done.wait [#allocation3], 1024  }
   0x6   :  { %284 = vsyncadd [#allocation3], 4294966272  ;;  %v290_v0 = vmov 1   ;;  %v291_v1 = vmov 0   ;;  %v292_v2 = vmov 2   ;;  %v28_v3 = vld [vmem:[%s324_s0] sm:$0xff]  ;;  %v30_v14 = vlaneseq }
   0x7   :  { %231 = vset.pattern.permute.xlu1 %v290_v0  ;;  %230 = vset.pattern.permute.xlu0 %v291_v1  ;;  %v219_v4 = vld [vmem:[#allocation2 + $0x38] sm:$0xff]  ;;  %v218_v5 = vld [vmem:[#allocation2 + $0x30] sm:$0xff]  ;;  %v29_v6 = vld [vmem:[%s324_s0 + $0x8] sm:$0xff]  ;;  %v293_v7 = vmov 3   ;;  %s294_s0 = smov [#allocation5]   ;;  %s167_s22 = sshll.u32 %s326_s2, 4  ;;  %s168_s22 = int_to_ptr.hbm [resolvable:$true] %s167_s22 }
   0x8   :  { %232 = vset.pattern.permute.xlu2 %v292_v2  ;;  %43 = vperm.xlu1 %231, %v28_v3   ;;  %v217_v8 = vld [vmem:[#allocation2 + $0x28] sm:$0xff]  ;;  %v216_v9 = vld [vmem:[#allocation2 + $0x20] sm:$0xff]  ;;  %v215_v10 = vld [vmem:[#allocation2 + $0x18] sm:$0xff]  ;;  %v31_v18 = vand.u32 127, %v30_v14  ;;  %s165_s19 = sshll.u32 %s294_s0, 4  ;;  %s295_s23 = smov 128   ;;  %s166_s19 = int_to_ptr.vmem [resolvable:$true] %s165_s19 }
   0x9   :  { %33 = vperm.xlu0 %230, %v28_v3   ;;  %55 = vperm.xlu2 %232, %v28_v3   ;;  %v214_v11 = vld [vmem:[#allocation2 + $0x10] sm:$0xff]  ;;  %v213_v12 = vld [vmem:[#allocation2 + $0x8] sm:$0xff]  ;;  %v212_v13 = vld [vmem:[#allocation2] sm:$0xff]  ;;  %s296_s24 = smov 8  }
   0xa   :  { %145 = vmatpush.bf16.msra.mxu0 %v219_v4 }
   0xe   :  { %146 = vmatpush.bf16.msra.mxu0 %v218_v5 }
  0x10   :  { %46 = vperm.xlu1 %231, %v29_v6  }
  0x11   :  { %36 = vperm.xlu0 %230, %v29_v6   ;;  %58 = vperm.xlu2 %232, %v29_v6  }
  0x12   :  { %147 = vmatpush.bf16.msra.mxu0 %v217_v8 }
  0x16   :  { %148 = vmatpush.bf16.msra.mxu0 %v216_v9 }
  0x18   :  { %234 = vset.pattern.permute.xlu1 %v293_v7 }
  0x19   :  { %233 = vset.pattern.permute.xlu0 %v293_v7  ;;  %70 = vperm.xlu1 %234, %v29_v6  }
  0x1a   :  { %67 = vperm.xlu0 %233, %v28_v3   ;;  %149 = vmatpush.bf16.msra.mxu0 %v215_v10 }
  0x1e   :  { %150 = vmatpush.bf16.msra.mxu0 %v214_v11 }
  0x22   :  { %151 = vmatpush.bf16.msra.mxu0 %v213_v12 }
  0x26   :  { %152 = vmatpush.bf16.msra.mxu0 %v212_v13 }
  0x63   :  { %v56_v17 = vpop.permute.xlu2 %55 }
  0x64   :  { %vm60_vm4 = vcmp.eq.s32.totalorder %v56_v17, %v31_v18 }
  0x65   :  { %v62_v28 = vsel %vm60_vm4, 1, %v291_v1 }
  0x6b   :  { %v59_v23 = vpop.permute.xlu2 %58 }
  0x6c   :  { %vm61_vm5 = vcmp.eq.s32.totalorder %v59_v23, %v31_v18 }
  0x6d   :  { %v63_v29 = vsel %vm61_vm5, 1, %v291_v1 }
  0x7a   :  { %v44_v15 = vpop.permute.xlu1 %43 }
  0x7b   :  { %v34_v16 = vpop.permute.xlu0 %33  ;;  %vm48_vm0 = vcmp.eq.s32.totalorder %v44_v15, %v31_v18 }
  0x7c   :  { %vm38_vm1 = vcmp.eq.s32.totalorder %v34_v16, %v31_v18  ;;  %v50_v21 = vsel %vm48_vm0, 1, %v291_v1 }
  0x7d   :  { %v40_v22 = vsel %vm38_vm1, 1, %v291_v1 }
  0x7e   :  { %v52_v26 = vadd.s32 %v50_v21, %v40_v22 }
  0x80   :  { %v64_v33 = vadd.s32 %v62_v28, %v52_v26 }
  0x82   :  { %v47_v19 = vpop.permute.xlu1 %46 }
  0x83   :  { %v37_v20 = vpop.permute.xlu0 %36  ;;  %vm49_vm2 = vcmp.eq.s32.totalorder %v47_v19, %v31_v18 }
  0x84   :  { %vm39_vm3 = vcmp.eq.s32.totalorder %v37_v20, %v31_v18  ;;  %v51_v24 = vsel %vm49_vm2, 1, %v291_v1 }
  0x85   :  { %v41_v25 = vsel %vm39_vm3, 1, %v291_v1 }
  0x86   :  { %v53_v27 = vadd.s32 %v51_v24, %v41_v25 }
  0x88   :  { %v65_v32 = vadd.s32 %v63_v29, %v53_v27 }
  0x8b   :  { %v71_v30 = vpop.permute.xlu1 %70 }
  0x8c   :  { %v68_v31 = vpop.permute.xlu0 %67  ;;  %vm73_vm6 = vcmp.eq.s32.totalorder %v71_v30, %v31_v18 }
  0x8d   :  { %vm72_vm7 = vcmp.eq.s32.totalorder %v68_v31, %v31_v18  ;;  %v75_v34 = vsel %vm73_vm6, 1, %v291_v1 }
  0x8e   :  { %v74_v35 = vsel %vm72_vm7, 1, %v291_v1  ;;  %v77_v36 = vadd.s32 %v75_v34, %v65_v32 }
  0x8f   :  { %v76_v37 = vadd.s32 %v74_v35, %v64_v33 }
  0x90   :  { %v79_v38 = vcvt.s32.f32 %v77_v36 }
  0x91   :  { %v78_v39 = vcvt.s32.f32 %v76_v37 }
  0x93   :  { %v80_v40 = vpack.c.bf16 %v79_v38, %v78_v39 }
  0x95   :  { %153 = vmatmul.bf16.vlgmr.msra.gmra.mxu0 %v80_v40 }
 0x112   :  { %v154_v41 = vpop.f32.mrf.mxu0 }
 0x113   :  { %159 = vst [vmem:[#allocation5] sm:$0xff] %v154_v41 }
 0x11a   :  { %v156_v42 = vpop.f32.mrf.mxu0 }
 0x11b   :  { %160 = vst [vmem:[#allocation5 + $0x8] sm:$0xff] %v156_v42 }
 0x11c   :  { %173 = dma.vmem_to_hbm [thread:$0]  %s166_s19, 256, %s168_s22, [#allocation4], %s295_s23, %s295_s23, %s296_s24  }
 0x11d   :  { %285 = dma.done.wait [#allocation4], 256  }
 0x11e   :  { %286 = vsyncadd [#allocation4], 4294967040 }
 0x11f   :  { %178 = vsyncpa [#allocation3], 1 }
 0x120   :  { %179 = vsyncpa [#allocation4], 1 }

// kernel: tpu_custom_call.1
= control target key start
LH: loop header
LB: loop body
LE: loop exit
PB: predicated region body
PF: predicated region fallthrough
CT: control target
= control target key end

     0   :  { %7 = vsyncpa [#allocation3], 0  ;;  %s324_s0 = inlined_call_operand.vmem [shape: s32[16,4], index: 0, kind: input, shape index: {}]   ;;  %s325_s1 = inlined_call_operand.hbm [shape: bf16[128,128], index: 1, kind: input, shape index: {}]   ;;  %s326_s2 = inlined_call_operand.hbm [shape: f32[16,128], index: 2, kind: output, shape index: {}]  }
   0x1   :  { %8 = vsyncpa [#allocation4], 0  ;;  %s15_s11 = sshll.u32 %s325_s1, 4  ;;  %s287_s12 = smov [#allocation2]   ;;  %s16_s11 = int_to_ptr.hbm [resolvable:$true] %s15_s11 }
   0x2   :  { %s17_s13 = sshll.u32 %s287_s12, 4  ;;  %s288_s14 = smov 64   ;;  %s18_s13 = int_to_ptr.vmem [resolvable:$true] %s17_s13 }
   0x3   :  { %s289_s15 = smov 4  }
   0x4   :  { %23 = dma.hbm_to_vmem [thread:$0]  %s16_s11, 1024, %s18_s13, [#allocation3], %s288_s14, %s288_s14, %s289_s15  }
   0x5   :  { %283 = dma.done.wait [#allocation3], 1024  }
   0x6   :  { %284 = vsyncadd [#allocation3], 4294966272  ;;  %v290_v0 = vmov 1   ;;  %v291_v1 = vmov 0   ;;  %v292_v2 = vmov 2   ;;  %v28_v3 = vld [vmem:[%s324_s0] sm:$0xff]  ;;  %v30_v14 = vlaneseq }
   0x7   :  { %231 = vset.pattern.permute.xlu1 %v290_v0  ;;  %230 = vset.pattern.permute.xlu0 %v291_v1  ;;  %v219_v4 = vld [vmem:[#allocation2 + $0x38] sm:$0xff]  ;;  %v218_v5 = vld [vmem:[#allocation2 + $0x30] sm:$0xff]  ;;  %v29_v6 = vld [vmem:[%s324_s0 + $0x8] sm:$0xff]  ;;  %v293_v7 = vmov 3   ;;  %s294_s0 = smov [#allocation5]   ;;  %s167_s22 = sshll.u32 %s326_s2, 4  ;;  %s168_s22 = int_to_ptr.hbm [resolvable:$true] %s167_s22 }
   0x8   :  { %232 = vset.pattern.permute.xlu2 %v292_v2  ;;  %43 = vperm.xlu1 %231, %v28_v3   ;;  %v217_v8 = vld [vmem:[#allocation2 + $0x28] sm:$0xff]  ;;  %v216_v9 = vld [vmem:[#allocation2 + $0x20] sm:$0xff]  ;;  %v215_v10 = vld [vmem:[#allocation2 + $0x18] sm:$0xff]  ;;  %v31_v18 = vand.u32 127, %v30_v14  ;;  %s165_s19 = sshll.u32 %s294_s0, 4  ;;  %s295_s23 = smov 128   ;;  %s166_s19 = int_to_ptr.vmem [resolvable:$true] %s165_s19 }
   0x9   :  { %33 = vperm.xlu0 %230, %v28_v3   ;;  %55 = vperm.xlu2 %232, %v28_v3   ;;  %v214_v11 = vld [vmem:[#allocation2 + $0x10] sm:$0xff]  ;;  %v213_v12 = vld [vmem:[#allocation2 + $0x8] sm:$0xff]  ;;  %v212_v13 = vld [vmem:[#allocation2] sm:$0xff]  ;;  %s296_s24 = smov 8  }
   0xa   :  { %145 = vmatpush.bf16.msra.mxu0 %v219_v4 }
   0xe   :  { %146 = vmatpush.bf16.msra.mxu0 %v218_v5 }
  0x10   :  { %46 = vperm.xlu1 %231, %v29_v6  }
  0x11   :  { %36 = vperm.xlu0 %230, %v29_v6   ;;  %58 = vperm.xlu2 %232, %v29_v6  }
  0x12   :  { %147 = vmatpush.bf16.msra.mxu0 %v217_v8 }
  0x16   :  { %148 = vmatpush.bf16.msra.mxu0 %v216_v9 }
  0x18   :  { %234 = vset.pattern.permute.xlu1 %v293_v7 }
  0x19   :  { %233 = vset.pattern.permute.xlu0 %v293_v7  ;;  %70 = vperm.xlu1 %234, %v29_v6  }
  0x1a   :  { %67 = vperm.xlu0 %233, %v28_v3   ;;  %149 = vmatpush.bf16.msra.mxu0 %v215_v10 }
  0x1e   :  { %150 = vmatpush.bf16.msra.mxu0 %v214_v11 }
  0x22   :  { %151 = vmatpush.bf16.msra.mxu0 %v213_v12 }
  0x26   :  { %152 = vmatpush.bf16.msra.mxu0 %v212_v13 }
  0x63   :  { %v56_v17 = vpop.permute.xlu2 %55 }
  0x64   :  { %vm60_vm4 = vcmp.eq.s32.totalorder %v56_v17, %v31_v18 }
  0x65   :  { %v62_v28 = vsel %vm60_vm4, 1, %v291_v1 }
  0x6b   :  { %v59_v23 = vpop.permute.xlu2 %58 }
  0x6c   :  { %vm61_vm5 = vcmp.eq.s32.totalorder %v59_v23, %v31_v18 }
  0x6d   :  { %v63_v29 = vsel %vm61_vm5, 1, %v291_v1 }
  0x7a   :  { %v44_v15 = vpop.permute.xlu1 %43 }
  0x7b   :  { %v34_v16 = vpop.permute.xlu0 %33  ;;  %vm48_vm0 = vcmp.eq.s32.totalorder %v44_v15, %v31_v18 }
  0x7c   :  { %vm38_vm1 = vcmp.eq.s32.totalorder %v34_v16, %v31_v18  ;;  %v50_v21 = vsel %vm48_vm0, 1, %v291_v1 }
  0x7d   :  { %v40_v22 = vsel %vm38_vm1, 1, %v291_v1 }
  0x7e   :  { %v52_v26 = vadd.s32 %v50_v21, %v40_v22 }
  0x80   :  { %v64_v33 = vadd.s32 %v62_v28, %v52_v26 }
  0x82   :  { %v47_v19 = vpop.permute.xlu1 %46 }
  0x83   :  { %v37_v20 = vpop.permute.xlu0 %36  ;;  %vm49_vm2 = vcmp.eq.s32.totalorder %v47_v19, %v31_v18 }
  0x84   :  { %vm39_vm3 = vcmp.eq.s32.totalorder %v37_v20, %v31_v18  ;;  %v51_v24 = vsel %vm49_vm2, 1, %v291_v1 }
  0x85   :  { %v41_v25 = vsel %vm39_vm3, 1, %v291_v1 }
  0x86   :  { %v53_v27 = vadd.s32 %v51_v24, %v41_v25 }
  0x88   :  { %v65_v32 = vadd.s32 %v63_v29, %v53_v27 }
  0x8b   :  { %v71_v30 = vpop.permute.xlu1 %70 }
  0x8c   :  { %v68_v31 = vpop.permute.xlu0 %67  ;;  %vm73_vm6 = vcmp.eq.s32.totalorder %v71_v30, %v31_v18 }
  0x8d   :  { %vm72_vm7 = vcmp.eq.s32.totalorder %v68_v31, %v31_v18  ;;  %v75_v34 = vsel %vm73_vm6, 1, %v291_v1 }
  0x8e   :  { %v74_v35 = vsel %vm72_vm7, 1, %v291_v1  ;;  %v77_v36 = vadd.s32 %v75_v34, %v65_v32 }
  0x8f   :  { %v76_v37 = vadd.s32 %v74_v35, %v64_v33 }
  0x90   :  { %v79_v38 = vcvt.s32.f32 %v77_v36 }
  0x91   :  { %v78_v39 = vcvt.s32.f32 %v76_v37 }
  0x93   :  { %v80_v40 = vpack.c.bf16 %v79_v38, %v78_v39 }
  0x95   :  { %153 = vmatmul.bf16.vlgmr.msra.gmra.mxu0 %v80_v40 }
 0x112   :  { %v154_v41 = vpop.f32.mrf.mxu0 }
 0x113   :  { %159 = vst [vmem:[#allocation5] sm:$0xff] %v154_v41 }
 0x11a   :  { %v156_v42 = vpop.f32.mrf.mxu0 }
 0x11b   :  { %160 = vst [vmem:[#allocation5 + $0x8] sm:$0xff] %v156_v42 }
 0x11c   :  { %173 = dma.vmem_to_hbm [thread:$0]  %s166_s19, 256, %s168_s22, [#allocation4], %s295_s23, %s295_s23, %s296_s24  }
 0x11d   :  { %285 = dma.done.wait [#allocation4], 256  }
 0x11e   :  { %286 = vsyncadd [#allocation4], 4294967040 }
 0x11f   :  { %178 = vsyncpa [#allocation3], 1 }
 0x120   :  { %179 = vsyncpa [#allocation4], 1 }

</bundles_post_ra>
